<compile_context>
chip_gen: v5e
topology: v5e:2x2
jax: 0.10.0
libtpu: 0.0.40
codegen_flags: <defaults>
</compile_context>

<pallas_src>
import functools

import jax
import jax.numpy as jnp
from jax import lax
from jax.experimental import pallas as pl
from jax.experimental.pallas import tpu as pltpu


# --------------------------------------------------------------------------- #
# Kernels
# --------------------------------------------------------------------------- #

def _bn_train_fused_kernel(x_ref, w_ref, b_ref, o_ref, mean_ref, var_ref, *,
                           eps, n_rows):
    """One column slab: full-batch stats (two-pass variance) + fused affine."""
    x = x_ref[...].astype(jnp.float32)                       # (B, td)

    mean = jnp.sum(x, axis=0, keepdims=True) * (1.0 / n_rows)   # (1, td)
    centered = x - mean
    denom = n_rows - 1.0 if n_rows > 1.0 else 1.0                # torch ddof=1
    var = jnp.sum(centered * centered, axis=0, keepdims=True) * (1.0 / denom)

    inv_std = lax.rsqrt(var + eps)                               # EUP slot
    scale = w_ref[...].astype(jnp.float32) * inv_std
    shift = b_ref[...].astype(jnp.float32) - mean * scale

    # Re-read x from VMEM for the output pass (VMEM loads are cheap; keeps the
    # slab from being nominally live across both passes -> fewer spills).
    o_ref[...] = (x_ref[...].astype(jnp.float32) * scale + shift).astype(o_ref.dtype)
    mean_ref[...] = mean
    var_ref[...] = var


def _bn_stats_kernel(x_ref, mean_ref, var_ref, sum_sc, ssq_sc, *, n_rows):
    """Batch-tiled stats: accumulate sum / sum-sq over the (arbitrary) batch axis."""
    i = pl.program_id(1)

    @pl.when(i == 0)
    def _init():
        sum_sc[...] = jnp.zeros_like(sum_sc)
        ssq_sc[...] = jnp.zeros_like(ssq_sc)

    x = x_ref[...].astype(jnp.float32)                       # (tb, td)
    sum_sc[...] += jnp.sum(x, axis=0, keepdims=True)
    ssq_sc[...] += jnp.sum(x * x, axis=0, keepdims=True)

    @pl.when(i == pl.num_programs(1) - 1)
    def _finalize():
        mean = sum_sc[...] * (1.0 / n_rows)
        denom = n_rows - 1.0 if n_rows > 1.0 else 1.0
        var = (ssq_sc[...] - n_rows * mean * mean) * (1.0 / denom)
        mean_ref[...] = mean
        var_ref[...] = jnp.maximum(var, 0.0)   # guard tiny negatives from cancellation


def _bn_affine_kernel(x_ref, scale_ref, shift_ref, o_ref):
    """Streaming elementwise: out = x * scale + shift  (per-feature scale/shift)."""
    o_ref[...] = (x_ref[...].astype(jnp.float32) * scale_ref[...]
                  + shift_ref[...]).astype(o_ref.dtype)


# --------------------------------------------------------------------------- #
# Tiling helpers
# --------------------------------------------------------------------------- #

def _round_up(n, m):
    return ((n + m - 1) // m) * m


def _pad2d(a, rows, cols):
    r, c = a.shape
    if r == rows and c == cols:
        return a
    return jnp.pad(a, ((0, rows - r), (0, cols - c)))


def _scoped_vmem_bytes():
    """Scoped VMEM limit to request (half of physical; <= 64 MiB)."""
    try:
        cap = int(pltpu.get_tpu_info().vmem_capacity_bytes)
    except Exception:
        cap = 64 * 1024 * 1024   # conservative: v7x physical VMEM per TC
    return min(cap // 2, 64 * 1024 * 1024)


def _pick_feature_tile(d_pad, max_td):
    """Largest 128-multiple divisor of d_pad <= max_td, preferring >= 2 grid steps."""
    max_td = max(128, (int(max_td) // 128) * 128)
    cands = [t for t in range(128, d_pad + 1, 128)
             if d_pad % t == 0 and t <= max_td]
    if not cands:
        cands = [128]
    multi = [t for t in cands if d_pad // t >= 2]
    return max(multi) if multi else max(cands)


def _pick_batch_tile(b):
    """(tb, b_pad): whole batch if small (block dim == full dim), else 512-row tiles."""
    if b <= 1024:
        return b, b
    tb = 512
    return tb, _round_up(b, tb)


# --------------------------------------------------------------------------- #
# Pallas-call wrappers
# --------------------------------------------------------------------------- #

def _affine_pass(x, scale, shift, d_pad, budget, scoped):
    """out = x * scale + shift, 2D-tiled streaming pass (shared by eval and training)."""
    B, D = x.shape
    itemsize = jnp.dtype(x.dtype).itemsize
    tb, b_pad = _pick_batch_tile(B)

    # in + out double-buffered + one f32 temp, per lane of feature tile.
    per_lane = tb * (4 * itemsize + 4)
    max_td = max(128, budget // per_lane)
    td = _pick_feature_tile(d_pad, min(512, max_td))

    x_p = _pad2d(x, b_pad, d_pad)
    scale_p = _pad2d(scale.reshape(1, D).astype(jnp.float32), 1, d_pad)
    shift_p = _pad2d(shift.reshape(1, D).astype(jnp.float32), 1, d_pad)

    grid = (b_pad // tb, d_pad // td)
    out_p = pl.pallas_call(
        _bn_affine_kernel,
        out_shape=jax.ShapeDtypeStruct((b_pad, d_pad), x.dtype),
        grid_spec=pltpu.PrefetchScalarGridSpec(
            num_scalar_prefetch=0,
            grid=grid,
            in_specs=[pl.BlockSpec((tb, td), lambda i, j: (i, j)),
                      pl.BlockSpec((1, td), lambda i, j: (0, j)),
                      pl.BlockSpec((1, td), lambda i, j: (0, j))],
            out_specs=pl.BlockSpec((tb, td), lambda i, j: (i, j))),
        compiler_params=pltpu.CompilerParams(
            dimension_semantics=("parallel", "parallel"),
            vmem_limit_bytes=scoped),
    )(x_p, scale_p, shift_p)
    return out_p[:B, :D]


def _batch_stats_pass(x, d_pad, budget, scoped):
    """Batch-tiled mean/var (VMEM-use independent of B). Returns f32 (D,), (D,)."""
    B, D = x.shape
    itemsize = jnp.dtype(x.dtype).itemsize
    tb, b_pad = _pick_batch_tile(B)

    per_lane = tb * (2 * itemsize + 4) + 16
    max_td = max(128, budget // per_lane)
    td = _pick_feature_tile(d_pad, min(512, max_td))

    x_p = _pad2d(x, b_pad, d_pad)   # zero rows contribute nothing to sum / sum-sq
    grid = (d_pad // td, b_pad // tb)   # batch (reduction) axis LAST

    kernel = functools.partial(_bn_stats_kernel, n_rows=float(B))
    mean_p, var_p = pl.pallas_call(
        kernel,
        out_shape=(jax.ShapeDtypeStruct((1, d_pad), jnp.float32),
                   jax.ShapeDtypeStruct((1, d_pad), jnp.float32)),
        grid_spec=pltpu.PrefetchScalarGridSpec(
            num_scalar_prefetch=0,
            grid=grid,
            in_specs=[pl.BlockSpec((tb, td), lambda j, i: (i, j))],
            out_specs=(pl.BlockSpec((1, td), lambda j, i: (0, j)),
                       pl.BlockSpec((1, td), lambda j, i: (0, j))),
            scratch_shapes=[pltpu.VMEM((1, td), jnp.float32),
                            pltpu.VMEM((1, td), jnp.float32)]),
        compiler_params=pltpu.CompilerParams(
            dimension_semantics=("parallel", "arbitrary"),
            vmem_limit_bytes=scoped),
    )(x_p)
    return mean_p[0, :D], var_p[0, :D]


def batch_norm(x, weight, bias, running_mean, running_var, *,
               eps=1e-5, momentum=0.1, training=True, force_batch_tiled=False):
    """BatchNorm forward. x: (B, D). Returns (out, new_running_mean, new_running_var)."""
    B, D = x.shape
    d_pad = _round_up(D, 128)
    itemsize = jnp.dtype(x.dtype).itemsize

    scoped = _scoped_vmem_bytes()
    budget = (scoped * 3) // 4   # leave headroom below the scoped limit

    if training:
        # Fused single-pass path needs the whole (B, td) slab resident:
        # ~2x(in)+2x(out) double-buffered blocks + f32 temporaries.
        per_lane = B * (4 * itemsize + 8)
        max_td_vmem = budget // per_lane
        use_fused = (max_td_vmem >= 128) and not force_batch_tiled

        if use_fused:
            td = _pick_feature_tile(d_pad, min(512, max_td_vmem))
            x_p = _pad2d(x, B, d_pad)
            w_p = _pad2d(weight.reshape(1, D).astype(jnp.float32), 1, d_pad)
            b_p = _pad2d(bias.reshape(1, D).astype(jnp.float32), 1, d_pad)

            x_spec = pl.BlockSpec((B, td), lambda j: (0, j))
            row_spec = pl.BlockSpec((1, td), lambda j: (0, j))
            kernel = functools.partial(_bn_train_fused_kernel,
                                       eps=float(eps), n_rows=float(B))
            out_p, mean_p, var_p = pl.pallas_call(
                kernel,
                out_shape=(jax.ShapeDtypeStruct((B, d_pad), x.dtype),
                           jax.ShapeDtypeStruct((1, d_pad), jnp.float32),
                           jax.ShapeDtypeStruct((1, d_pad), jnp.float32)),
                grid_spec=pltpu.PrefetchScalarGridSpec(
                    num_scalar_prefetch=0,
                    grid=(d_pad // td,),
                    in_specs=[x_spec, row_spec, row_spec],
                    out_specs=(x_spec, row_spec, row_spec)),
                compiler_params=pltpu.CompilerParams(
                    dimension_semantics=("parallel",),
                    vmem_limit_bytes=scoped),
            )(x_p, w_p, b_p)
            out = out_p[:, :D]
            mean = mean_p[0, :D]
            var = var_p[0, :D]
        else:
            # Batch-independent VMEM: stats kernel + shared affine kernel
            # (one extra HBM read of x).
            mean, var = _batch_stats_pass(x, d_pad, budget, scoped)
            scale = weight.astype(jnp.float32) * lax.rsqrt(var + eps)
            shift = bias.astype(jnp.float32) - mean * scale
            out = _affine_pass(x, scale, shift, d_pad, budget, scoped)

        new_rm = (1.0 - momentum) * running_mean + momentum * mean
        new_rv = (1.0 - momentum) * running_var + momentum * var
        return out, new_rm, new_rv

    # Eval: fold running stats + affine into per-feature scale/shift (tiny
    # (D,) vectors outside), single fused streaming pass in-kernel.
    scale = weight.astype(jnp.float32) * lax.rsqrt(running_var.astype(jnp.float32) + eps)
    shift = bias.astype(jnp.float32) - running_mean.astype(jnp.float32) * scale
    out = _affine_pass(x, scale, shift, d_pad, budget, scoped)
    return out, running_mean, running_var


# --------------------------------------------------------------------------- #
# Pure-JAX reference (mirrors the PyTorch module)
# --------------------------------------------------------------------------- #

def batch_norm_ref(x, weight, bias, running_mean, running_var, *,
                   eps=1e-5, momentum=0.1, training=True):
    xf = x.astype(jnp.float32)
    if training:
        mean = jnp.mean(xf, axis=0)
        var = jnp.var(xf, axis=0, ddof=1)          # torch.var default: unbiased
        new_rm = (1.0 - momentum) * running_mean + momentum * mean
        new_rv = (1.0 - momentum) * running_var + momentum * var
    else:
        mean = running_mean.astype(jnp.float32)
        var = running_var.astype(jnp.float32)
        new_rm, new_rv = running_mean, running_var
    out = (xf - mean) / jnp.sqrt(var + eps)
    out = out * weight + bias
    return out.astype(x.dtype), new_rm, new_rv


if __name__ == "__main__":
    key = jax.random.PRNGKey(0)
    kx, kw, kb = jax.random.split(key, 3)

    B, D = 8, 32          # (batch, d_model)
    eps, momentum = 1e-5, 0.1

    x = jax.random.normal(kx, (B, D), dtype=jnp.float32)
    weight = 1.0 + 0.1 * jax.random.normal(kw, (D,), dtype=jnp.float32)
    bias = 0.1 * jax.random.normal(kb, (D,), dtype=jnp.float32)
    running_mean = jnp.zeros((D,), dtype=jnp.float32)
    running_var = jnp.ones((D,), dtype=jnp.float32)

    # Training-mode forward (fused single-kernel path).
    out, rm, rv = batch_norm(x, weight, bias, running_mean, running_var,
                             eps=eps, momentum=momentum, training=True)
    out, rm, rv = jax.block_until_ready((out, rm, rv))

    ref_out, ref_rm, ref_rv = batch_norm_ref(
        x, weight, bias, running_mean, running_var,
        eps=eps, momentum=momentum, training=True)
    assert out.shape == (B, D)
    assert jnp.allclose(out, ref_out, atol=1e-5, rtol=1e-5), "train output mismatch"
    assert jnp.allclose(rm, ref_rm, atol=1e-5, rtol=1e-5), "running_mean mismatch"
    assert jnp.allclose(rv, ref_rv, atol=1e-5, rtol=1e-5), "running_var mismatch"

    # Training-mode forward via the batch-tiled (large-B) fallback path.
    out_t, rm_t, rv_t = batch_norm(x, weight, bias, running_mean, running_var,
                                   eps=eps, momentum=momentum, training=True,
                                   force_batch_tiled=True)
    out_t, rm_t, rv_t = jax.block_until_ready((out_t, rm_t, rv_t))
    assert jnp.allclose(out_t, ref_out, atol=1e-5, rtol=1e-5), "tiled train output mismatch"
    assert jnp.allclose(rm_t, ref_rm, atol=1e-5, rtol=1e-5), "tiled running_mean mismatch"
    assert jnp.allclose(rv_t, ref_rv, atol=1e-5, rtol=1e-5), "tiled running_var mismatch"

    # Eval-mode forward with the updated running statistics.
    out_e, _, _ = batch_norm(x, weight, bias, rm, rv,
                             eps=eps, momentum=momentum, training=False)
    out_e = jax.block_until_ready(out_e)
    ref_e, _, _ = batch_norm_ref(x, weight, bias, rm, rv,
                                 eps=eps, momentum=momentum, training=False)
    assert jnp.allclose(out_e, ref_e, atol=1e-5, rtol=1e-5), "eval output mismatch"

    print("KERNEL_OK")
</pallas_src>

<mosaic_0001>
module attributes {stable_mosaic.version = 11 : i64} {
  func.func @_bn_train_fused_kernel(%arg0: i32, %arg1: memref<8x128xf32, #tpu.memory_space<vmem>>, %arg2: memref<1x128xf32, #tpu.memory_space<vmem>>, %arg3: memref<1x128xf32, #tpu.memory_space<vmem>>, %arg4: memref<8x128xf32, #tpu.memory_space<vmem>>, %arg5: memref<1x128xf32, #tpu.memory_space<vmem>>, %arg6: memref<1x128xf32, #tpu.memory_space<vmem>>) attributes {dimension_semantics = [#tpu.dimension_semantics<parallel>], iteration_bounds = array<i64: 1>, scalar_prefetch = 0 : i64, scratch_operands = 0 : i64, tpu.core_type = #tpu.core_type<tc>, window_params = [{transform_indices = @transform_0, window_bounds = array<i64: 8, 128>}, {transform_indices = @transform_1, window_bounds = array<i64: 1, 128>}, {transform_indices = @transform_2, window_bounds = array<i64: 1, 128>}, {transform_indices = @transform_3, window_bounds = array<i64: 8, 128>}, {transform_indices = @transform_4, window_bounds = array<i64: 1, 128>}, {transform_indices = @transform_5, window_bounds = array<i64: 1, 128>}]} {
    %c0 = arith.constant 0 : index
    %c0_0 = arith.constant 0 : index
    %0 = vector.load %arg1[%c0, %c0_0] : memref<8x128xf32, #tpu.memory_space<vmem>>, vector<8x128xf32>
    %cst = arith.constant dense<0.000000e+00> : vector<128xf32>
    %1 = vector.multi_reduction <add>, %0, %cst [0] : vector<8x128xf32> to vector<128xf32>
    %2 = vector.shape_cast %1 : vector<128xf32> to vector<1x128xf32>
    %cst_1 = arith.constant 1.250000e-01 : f32
    %3 = vector.broadcast %cst_1 : f32 to vector<1x128xf32>
    %4 = arith.mulf %2, %3 : vector<1x128xf32>
    %5 = vector.broadcast %4 : vector<1x128xf32> to vector<8x128xf32>
    %6 = arith.subf %0, %5 : vector<8x128xf32>
    %7 = arith.mulf %6, %6 : vector<8x128xf32>
    %cst_2 = arith.constant dense<0.000000e+00> : vector<128xf32>
    %8 = vector.multi_reduction <add>, %7, %cst_2 [0] : vector<8x128xf32> to vector<128xf32>
    %9 = vector.shape_cast %8 : vector<128xf32> to vector<1x128xf32>
    %cst_3 = arith.constant 0.142857149 : f32
    %10 = vector.broadcast %cst_3 : f32 to vector<1x128xf32>
    %11 = arith.mulf %9, %10 : vector<1x128xf32>
    %cst_4 = arith.constant 9.99999974E-6 : f32
    %12 = vector.broadcast %cst_4 : f32 to vector<1x128xf32>
    %13 = arith.addf %11, %12 : vector<1x128xf32>
    %14 = math.rsqrt %13 : vector<1x128xf32>
    %c0_5 = arith.constant 0 : index
    %c0_6 = arith.constant 0 : index
    %15 = vector.load %arg2[%c0_5, %c0_6] : memref<1x128xf32, #tpu.memory_space<vmem>>, vector<1x128xf32>
    %16 = arith.mulf %15, %14 : vector<1x128xf32>
    %c0_7 = arith.constant 0 : index
    %c0_8 = arith.constant 0 : index
    %17 = vector.load %arg3[%c0_7, %c0_8] : memref<1x128xf32, #tpu.memory_space<vmem>>, vector<1x128xf32>
    %18 = arith.mulf %4, %16 : vector<1x128xf32>
    %19 = arith.subf %17, %18 : vector<1x128xf32>
    %c0_9 = arith.constant 0 : index
    %c0_10 = arith.constant 0 : index
    %20 = vector.load %arg1[%c0_9, %c0_10] : memref<8x128xf32, #tpu.memory_space<vmem>>, vector<8x128xf32>
    %21 = vector.broadcast %16 : vector<1x128xf32> to vector<8x128xf32>
    %22 = arith.mulf %20, %21 : vector<8x128xf32>
    %23 = vector.broadcast %19 : vector<1x128xf32> to vector<8x128xf32>
    %24 = arith.addf %22, %23 : vector<8x128xf32>
    %c0_11 = arith.constant 0 : index
    %c0_12 = arith.constant 0 : index
    %25 = vector.load %arg4[%c0_11, %c0_12] : memref<8x128xf32, #tpu.memory_space<vmem>>, vector<8x128xf32>
    tpu.vector_store %arg4[%c0_11, %c0_12], %24 {strides = array<i32>} : memref<8x128xf32, #tpu.memory_space<vmem>>, vector<8x128xf32>,
    %c0_13 = arith.constant 0 : index
    %c0_14 = arith.constant 0 : index
    %26 = vector.load %arg5[%c0_13, %c0_14] : memref<1x128xf32, #tpu.memory_space<vmem>>, vector<1x128xf32>
    tpu.vector_store %arg5[%c0_13, %c0_14], %4 {strides = array<i32>} : memref<1x128xf32, #tpu.memory_space<vmem>>, vector<1x128xf32>,
    %c0_15 = arith.constant 0 : index
    %c0_16 = arith.constant 0 : index
    %27 = vector.load %arg6[%c0_15, %c0_16] : memref<1x128xf32, #tpu.memory_space<vmem>>, vector<1x128xf32>
    tpu.vector_store %arg6[%c0_15, %c0_16], %11 {strides = array<i32>} : memref<1x128xf32, #tpu.memory_space<vmem>>, vector<1x128xf32>,
    return
  }
  func.func @transform_0(%arg0: i32) -> (i32, i32) {
    %c0_i32 = arith.constant 0 : i32
    %c0_i32_0 = arith.constant 0 : i32
    return %c0_i32, %arg0 : i32, i32
  }
  func.func @transform_1(%arg0: i32) -> (i32, i32) {
    %c0_i32 = arith.constant 0 : i32
    %c0_i32_0 = arith.constant 0 : i32
    return %c0_i32, %arg0 : i32, i32
  }
  func.func @transform_2(%arg0: i32) -> (i32, i32) {
    %c0_i32 = arith.constant 0 : i32
    %c0_i32_0 = arith.constant 0 : i32
    return %c0_i32, %arg0 : i32, i32
  }
  func.func @transform_3(%arg0: i32) -> (i32, i32) {
    %c0_i32 = arith.constant 0 : i32
    %c0_i32_0 = arith.constant 0 : i32
    return %c0_i32, %arg0 : i32, i32
  }
  func.func @transform_4(%arg0: i32) -> (i32, i32) {
    %c0_i32 = arith.constant 0 : i32
    %c0_i32_0 = arith.constant 0 : i32
    return %c0_i32, %arg0 : i32, i32
  }
  func.func @transform_5(%arg0: i32) -> (i32, i32) {
    %c0_i32 = arith.constant 0 : i32
    %c0_i32_0 = arith.constant 0 : i32
    return %c0_i32, %arg0 : i32, i32
  }
}

</mosaic_0001>

<bundles_post_ra>
// kernel: tpu_custom_call.1
= control target key start
LH: loop header
LB: loop body
LE: loop exit
PB: predicated region body
PF: predicated region fallthrough
CT: control target
= control target key end

     0   :  { %11 = vsyncpa [#allocation3], 0  ;;  %s328_s0 = inlined_call_operand.hbm [shape: f32[8,128], index: 0, kind: input, shape index: {}]   ;;  %s329_s1 = inlined_call_operand.hbm [shape: f32[1,128], index: 1, kind: input, shape index: {}]   ;;  %s330_s2 = inlined_call_operand.vmem [shape: f32[1,128], index: 2, kind: input, shape index: {}]   ;;  %s331_s3 = inlined_call_operand.hbm [shape: f32[8,128], index: 3, kind: output, shape index: {0}]   ;;  %s332_s4 = inlined_call_operand.hbm [shape: f32[1,128], index: 4, kind: output, shape index: {1}]   ;;  %s333_s5 = inlined_call_operand.hbm [shape: f32[1,128], index: 5, kind: output, shape index: {2}]  }
   0x1   :  { %12 = vsyncpa [#allocation6], 0 }
   0x2   :  { %13 = vsyncpa [#allocation4], 0 }
   0x3   :  { %14 = vsyncpa [#allocation9], 0  ;;  %s20_s20 = sshll.u32 %s328_s0, 4  ;;  %s275_s21 = smov [#allocation2]   ;;  %s21_s20 = int_to_ptr.hbm [resolvable:$true] %s20_s20 }
   0x4   :  { %s22_s22 = sshll.u32 %s275_s21, 4  ;;  %s31_s25 = sshll.u32 %s329_s1, 4  ;;  %s23_s22 = int_to_ptr.vmem [resolvable:$true] %s22_s22  ;;  %s32_s25 = int_to_ptr.hbm [resolvable:$true] %s31_s25 }
   0x5   :  { %25 = dma.hbm_to_vmem [thread:$0]  %s21_s20, 128, %s23_s22, [#allocation3]  }
   0x6   :  { %s276_s26 = smov [#allocation5]  }
   0x7   :  { %s33_s27 = sshll.u32 %s276_s26, 4  ;;  %s34_s27 = int_to_ptr.vmem [resolvable:$true] %s33_s27 }
   0x8   :  { %36 = dma.hbm_to_vmem [thread:$0]  %s32_s25, 16, %s34_s27, [#allocation6]  }
   0x9   :  { %267 = dma.done.wait [#allocation3], 128  }
   0xa   :  { %268 = vsyncadd [#allocation3], 4294967168 }
   0xb   :  { %269 = dma.done.wait [#allocation6], 16  }
   0xc   :  { %270 = vsyncadd [#allocation6], 4294967280  ;;  %v47_v0 = vld [vmem:[#allocation2] sm:$0xff]  ;;  %s277_s0 = smov [#allocation8]   ;;  %s109_s30 = sshll.u32 %s332_s4, 4  ;;  %s110_s30 = int_to_ptr.hbm [resolvable:$true] %s109_s30 }
   0xd   :  { %v48_v1 = vrot.slane %v47_v0, 4  ;;  %s107_s28 = sshll.u32 %s277_s0, 4  ;;  %s278_s6 = smov [#allocation10]   ;;  %v75_v24 = vld [vmem:[#allocation5] sm:$0x1]  ;;  %s108_s28 = int_to_ptr.vmem [resolvable:$true] %s107_s28 }
   0xe   :  { %s118_s7 = sshll.u32 %s278_s6, 4  ;;  %s120_s10 = sshll.u32 %s333_s5, 4  ;;  %v77_v27 = vld [vmem:[%s330_s2] sm:$0x1]  ;;  %s119_s7 = int_to_ptr.vmem [resolvable:$true] %s118_s7  ;;  %s121_s10 = int_to_ptr.hbm [resolvable:$true] %s120_s10 }
   0xf   :  { %v49_v2 = vadd.f32 %v48_v1, %v47_v0  ;;  %s279_s11 = smov [#allocation7]   ;;  %s98_s15 = sshll.u32 %s331_s3, 4  ;;  %s99_s15 = int_to_ptr.hbm [resolvable:$true] %s98_s15 }
  0x10   :  { %s96_s12 = sshll.u32 %s279_s11, 4  ;;  %s97_s12 = int_to_ptr.vmem [resolvable:$true] %s96_s12 }
  0x11   :  { %v50_v3 = vrot.slane %v49_v2, 2 }
  0x13   :  { %v51_v4 = vadd.f32 %v50_v3, %v49_v2 }
  0x15   :  { %v52_v5 = vrot.slane %v51_v4, 1 }
  0x17   :  { %v53_v6 = vadd.f32 %v52_v5, %v51_v4 }
  0x19   :  { %v54_v7 = vmul.f32 0.125, %v53_v6 }
  0x1b   :  { %v55_v8 = vsub.f32 %v47_v0, %v54_v7  ;;  %89 = vst [vmem:[#allocation8] sm:$0x1] %v54_v7 }
  0x1c   :  { %112 = dma.vmem_to_hbm [thread:$0]  %s108_s28, 16, %s110_s30, [#allocation9]  }
  0x1d   :  { %v56_v9 = vmul.f32 %v55_v8, %v55_v8 }
  0x1f   :  { %v57_v10 = vrot.slane %v56_v9, 4 }
  0x21   :  { %v58_v11 = vadd.f32 %v57_v10, %v56_v9 }
  0x23   :  { %v59_v12 = vrot.slane %v58_v11, 2 }
  0x25   :  { %v60_v13 = vadd.f32 %v59_v12, %v58_v11 }
  0x27   :  { %v61_v14 = vrot.slane %v60_v13, 1 }
  0x29   :  { %v62_v15 = vadd.f32 %v61_v14, %v60_v13 }
  0x2b   :  { %v63_v16 = vmul.f32 0.14285715, %v62_v15 }
  0x2d   :  { %90 = vst [vmem:[#allocation10] sm:$0x1] %v63_v16  ;;  %v64_v17 = vadd.f32 1e-05, %v63_v16 }
  0x2e   :  { %123 = dma.vmem_to_hbm [thread:$0]  %s119_s7, 16, %s121_s10, [#allocation9]  }
  0x2f   :  { %145 = vrsqrt.f32 %v64_v17  ;;  %vm71_vm0 = vweird.f32 %v64_v17 }
  0x35   :  { %v146_v18 = vpop.eup %145 }
  0x36   :  { %v66_v19 = vmul.f32 %v146_v18, %v64_v17  ;;  %vm72_vm1 = vweird.f32 %v146_v18 }
  0x37   :  { %vm73_vm2 = vmor %vm71_vm0, %vm72_vm1 }
  0x38   :  { %v67_v20 = vmul.f32 %v146_v18, %v66_v19 }
  0x3a   :  { %v68_v21 = vmul.f32 0.5, %v67_v20 }
  0x3c   :  { %v69_v22 = vsub.f32 1.5, %v68_v21 }
  0x3e   :  { %v70_v23 = vmul.f32 %v146_v18, %v69_v22 }
  0x40   :  { %v74_v25 = vsel %vm73_vm2, %v146_v18, %v70_v23 }
  0x41   :  { %v76_v26 = vmul.f32 %v75_v24, %v74_v25 }
  0x43   :  { %v78_v28 = vmul.f32 %v76_v26, %v54_v7  ;;  %v81_v29 = vperm.slane %v76_v26, 0 }
  0x45   :  { %v79_v30 = vsub.f32 %v77_v27, %v78_v28  ;;  %v83_v31 = vmul.f32 %v81_v29, %v47_v0 }
  0x47   :  { %v85_v32 = vperm.slane %v79_v30, 0 }
  0x49   :  { %v87_v33 = vadd.f32 %v85_v32, %v83_v31 }
  0x4b   :  { %88 = vst [vmem:[#allocation7] sm:$0xff] %v87_v33 }
  0x4c   :  { %101 = dma.vmem_to_hbm [thread:$0]  %s97_s12, 128, %s99_s15, [#allocation4]  }
  0x4d   :  { %271 = dma.done.wait [#allocation4], 128  }
  0x4e   :  { %272 = vsyncadd [#allocation4], 4294967168 }
  0x4f   :  { %273 = dma.done.wait [#allocation9], 32  }
  0x50   :  { %274 = vsyncadd [#allocation9], 4294967264 }
  0x51   :  { %136 = vsyncpa [#allocation3], 1 }
  0x52   :  { %137 = vsyncpa [#allocation6], 1 }
  0x53   :  { %138 = vsyncpa [#allocation4], 1 }
  0x54   :  { %139 = vsyncpa [#allocation9], 1 }

</bundles_post_ra>
